<compile_context>
chip_gen: v5e
topology: v5e:2x2
jax: 0.10.0
libtpu: 0.0.40
codegen_flags: <defaults>
</compile_context>

<pallas_src>
import jax
import jax.numpy as jnp
from jax import lax
from jax.experimental import pallas as pl
from jax.experimental.pallas import tpu as pltpu


def _round_up(x, m):
    return (x + m - 1) // m * m


def embed_bag_kernel(idx_ref, w_ref, out_ref):
    """One grid step pools TILE_BAGS bags.

    idx_ref : VMEM (TILE_BAGS, L) int32 padded index matrix (-1 = empty slot)
    w_ref   : VMEM (Vp, Dp) full (padded) embedding table, single copy
    out_ref : VMEM (TILE_BAGS, Dp) output tile
    """
    tb, L = idx_ref.shape
    vp = w_ref.shape[0]

    idx = idx_ref[...]                                       # (tb, L) int32
    col = lax.broadcasted_iota(jnp.int32, (tb, vp), 1)       # table-row ids on lanes

    # counts[r, v] = multiplicity of table row v inside bag r (one-hot for L==1).
    counts = jnp.zeros((tb, vp), jnp.float32)
    for l in range(L):                    # static unroll; L == max bag length
        counts = counts + (col == idx[:, l:l + 1]).astype(jnp.float32)

    # Pool on the MXU: (tb, Vp) @ (Vp, Dp), f32 accumulation.
    acc = jnp.dot(counts, w_ref[...].astype(jnp.float32),
                  preferred_element_type=jnp.float32)
    out_ref[...] = acc.astype(out_ref.dtype)                 # one lane-dense store


def cuemb_embedding(weight, indices, offsets, *, tile_bags=256):
    """Pallas equivalent of cuemb_embedding(weight, indices, offsets)."""
    V, D = weight.shape
    assert V < 2 ** 31 and indices.shape[0] < 2 ** 31, "int32 index range exceeded"
    num_bags = int(offsets.shape[0]) - 1

    indices = indices.astype(jnp.int32)
    offsets = offsets.astype(jnp.int32)

    # ---- CSR -> dense padded (num_bags, L) index matrix (layout plumbing) ----
    bag_len = offsets[1:] - offsets[:-1]                      # (num_bags,)
    max_len = int(jax.device_get(jnp.max(bag_len))) if num_bags > 0 else 0
    L = max(1, max_len)
    pos = offsets[:-1][:, None] + jnp.arange(L, dtype=jnp.int32)[None, :]
    valid = jnp.arange(L, dtype=jnp.int32)[None, :] < bag_len[:, None]
    if indices.shape[0] > 0:
        gathered = indices[jnp.clip(pos, 0, indices.shape[0] - 1)]
    else:
        gathered = jnp.zeros((num_bags, L), jnp.int32)
    idx_mat = jnp.where(valid, gathered, -1)                  # (num_bags, L) int32

    # ---- Padding: lane-dense output, 8/128-aligned tiles ----
    tb = min(tile_bags, _round_up(max(num_bags, 1), 8))
    nb_pad = _round_up(max(num_bags, 1), tb)
    Vp = _round_up(V, 128)
    Dp = _round_up(D, 128)

    if nb_pad > num_bags:
        idx_mat = jnp.concatenate(
            [idx_mat, jnp.full((nb_pad - num_bags, L), -1, jnp.int32)], axis=0)
    w_pad = jnp.zeros((Vp, Dp), weight.dtype).at[:V, :D].set(weight)

    itemsize = jnp.dtype(weight.dtype).itemsize
    est = (Vp * Dp * itemsize                     # table (single copy)
           + 2 * tb * (L * 4 + Dp * itemsize)     # double-buffered idx + out tiles
           + tb * Vp * 4)                         # one-hot counts
    vmem_limit = int(min(max(3 * est, 32 << 20), 56 << 20))

    out_pad = pl.pallas_call(
        embed_bag_kernel,
        out_shape=jax.ShapeDtypeStruct((nb_pad, Dp), weight.dtype),
        grid_spec=pltpu.PrefetchScalarGridSpec(
            num_scalar_prefetch=0,
            grid=(nb_pad // tb,),
            in_specs=[
                pl.BlockSpec((tb, L), lambda t: (t, 0)),
                # Whole padded table resident in VMEM, single copy (its block
                # never changes across the grid -> no double buffering).
                pl.BlockSpec(memory_space=pltpu.MemorySpace.VMEM),
            ],
            out_specs=pl.BlockSpec((tb, Dp), lambda t: (t, 0)),
        ),
        compiler_params=pltpu.CompilerParams(
            dimension_semantics=("parallel",),    # bags are independent
            vmem_limit_bytes=vmem_limit,
        ),
    )(idx_mat, w_pad)

    return out_pad[:num_bags, :D]


class CuEmbedModule:
    """Mirror of the PyTorch module: holds the weight, forward = cuemb_embedding."""

    def __init__(self, weight):
        self.weight = weight

    def __call__(self, indices, offsets):
        return cuemb_embedding(self.weight, indices, offsets)


if __name__ == "__main__":
    key = jax.random.PRNGKey(0)
    k_w, k_i = jax.random.split(key)

    # Small shapes consistent with the module's forward (spec: one index per bag).
    num_embeddings = 64      # rows in the embedding table
    embed_dim = 32           # embedding width
    num_bags = 300           # like `n` in the test, scaled down; exercises tiling + padding

    weight = jax.random.normal(k_w, (num_embeddings, embed_dim), jnp.float32)

    # Faithful to the test setup: offsets = [0, 1, ..., n]  -> one index per bag.
    offsets = jnp.arange(num_bags + 1, dtype=jnp.int32)
    indices = jax.random.randint(k_i, (num_bags,), 0, num_embeddings,
                                 dtype=jnp.int32)

    mod = CuEmbedModule(weight)
    out = jax.block_until_ready(mod(indices, offsets))

    ref = weight[indices]    # one index per bag -> plain row gather
    assert out.shape == (num_bags, embed_dim)
    assert jnp.allclose(out, ref, atol=1e-5, rtol=1e-5)

    # Extra check: irregular bags (multi-index + an empty bag) still match.
    offsets2 = jnp.array([0, 2, 2, 5, 6], dtype=jnp.int32)   # 4 bags
    indices2 = jnp.array([3, 7, 1, 1, 63, 0], dtype=jnp.int32)
    out2 = jax.block_until_ready(mod(indices2, offsets2))
    ref2 = jnp.stack([
        weight[indices2[int(offsets2[b]):int(offsets2[b + 1])]].sum(axis=0)
        for b in range(4)
    ])
    assert jnp.allclose(out2, ref2, atol=1e-5, rtol=1e-5)

    print("KERNEL_OK")
</pallas_src>

<mosaic_0001>
module attributes {stable_mosaic.version = 11 : i64} {
  func.func @embed_bag_kernel(%arg0: i32, %arg1: memref<256x1xi32, #tpu.memory_space<vmem>>, %arg2: memref<128x128xf32, #tpu.memory_space<vmem>>, %arg3: memref<256x128xf32, #tpu.memory_space<vmem>>) attributes {dimension_semantics = [#tpu.dimension_semantics<parallel>], iteration_bounds = array<i64: 2>, scalar_prefetch = 0 : i64, scratch_operands = 0 : i64, tpu.core_type = #tpu.core_type<tc>, window_params = [{transform_indices = @transform_0, window_bounds = array<i64: 256, 1>}, {pipeline_mode = #tpu.pipeline_mode<synchronous>, transform_indices = @transform_1, window_bounds = array<i64: 128, 128>}, {transform_indices = @transform_2, window_bounds = array<i64: 256, 128>}]} {
    %c0 = arith.constant 0 : index
    %c0_0 = arith.constant 0 : index
    %0 = vector.load %arg1[%c0, %c0_0] : memref<256x1xi32, #tpu.memory_space<vmem>>, vector<256x1xi32>
    %1 = tpu.iota {dimensions = array<i32: 1>} : vector<256x128xi32>
    %cst = arith.constant 0.000000e+00 : f32
    %2 = vector.broadcast %cst : f32 to vector<256x128xf32>
    %3 = vector.broadcast %0 : vector<256x1xi32> to vector<256x128xi32>
    %4 = arith.cmpi eq, %1, %3 : vector<256x128xi32>
    %5 = arith.extui %4 : vector<256x128xi1> to vector<256x128xi32>
    %6 = arith.sitofp %5 : vector<256x128xi32> to vector<256x128xf32>
    %7 = arith.addf %2, %6 : vector<256x128xf32>
    %c0_1 = arith.constant 0 : index
    %c0_2 = arith.constant 0 : index
    %8 = vector.load %arg2[%c0_1, %c0_2] : memref<128x128xf32, #tpu.memory_space<vmem>>, vector<128x128xf32>
    %cst_3 = arith.constant dense<0.000000e+00> : vector<256x128xf32>
    %9 = tpu.matmul %7, %8, %cst_3 {dimension_numbers = #tpu.dot_dimension_numbers<[1], [0], [0], [1], [0, 0, 1, 1], [], []>} : vector<256x128xf32>, vector<128x128xf32>, vector<256x128xf32> -> vector<256x128xf32>
    %c0_4 = arith.constant 0 : index
    %c0_5 = arith.constant 0 : index
    %10 = vector.load %arg3[%c0_4, %c0_5] : memref<256x128xf32, #tpu.memory_space<vmem>>, vector<256x128xf32>
    tpu.vector_store %arg3[%c0_4, %c0_5], %9 {strides = array<i32>} : memref<256x128xf32, #tpu.memory_space<vmem>>, vector<256x128xf32>,
    return
  }
  func.func @transform_0(%arg0: i32) -> (i32, i32) {
    %c0_i32 = arith.constant 0 : i32
    %c0_i32_0 = arith.constant 0 : i32
    return %arg0, %c0_i32 : i32, i32
  }
  func.func @transform_1(%arg0: i32) -> (i32, i32) {
    %c0_i32 = arith.constant 0 : i32
    %c0_i32_0 = arith.constant 0 : i32
    %c0_i32_1 = arith.constant 0 : i32
    return %c0_i32, %c0_i32_0 : i32, i32
  }
  func.func @transform_2(%arg0: i32) -> (i32, i32) {
    %c0_i32 = arith.constant 0 : i32
    %c0_i32_0 = arith.constant 0 : i32
    return %arg0, %c0_i32 : i32, i32
  }
}

</mosaic_0001>

<bundles_post_ra>
// kernel: tpu_custom_call.1
= control target key start
LH: loop header
LB: loop body
LE: loop exit
PB: predicated region body
PF: predicated region fallthrough
CT: control target
= control target key end

     0   :  { %7 = vsyncpa [#allocation3], 0  ;;  %s1167_s0 = inlined_call_operand.vmem [shape: s32[512,1], index: 0, kind: input, shape index: {}]   ;;  %s1168_s1 = inlined_call_operand.vmem [shape: f32[128,128], index: 1, kind: input, shape index: {}]   ;;  %s1169_s2 = inlined_call_operand.hbm [shape: f32[512,128], index: 2, kind: output, shape index: {}]  }
   0x1   :  { %9 = vsyncpa [#allocation3 + $0x1], 0  ;;  %s896_s9 = smov 0   ;;  %s898_s10 = smov 0  }
   0x2   :  { %s900_s11 = smov 0   ;;  %s902_s12 = smov 0  }
   0x3 LB: > { %s917_s13 = sadd.s32 4294967295, %s875_s12   ;;  %s642_s14 = sadd.s32 4294967294, %s875_s12   ;;  %s875_s12 = sphi %s902_s12, %s1175_s12   ;;  %s871_s11 = sphi %s900_s11, %s1174_s11   ;;  %s867_s10 = sphi %s898_s10, %s1173_s10   ;;  %s863_s9 = sphi %s896_s9, %s1172_s9  }
   0x4   : > { %s921_s15 = sadd.s32 1, %s875_s12   ;;  %s69_s16 = sadd.s32 1, %s871_s11 }
   0x5   : > { %s66_s17 = ssub.s32 %s875_s12, %s921_s15  ;;  %p79_p0 = scmp.ne.s32.totalorder %s871_s11, %s867_s10 }
   0x6   : > { %p67_p1 = scmp.eq.s32.totalorder %s66_s17, 0  ;;  %p80_p2 = scmp.eq.s32.totalorder %s917_s13, 1 }
   0x7   : > { %p85_p3 = scmp.ne.s32.totalorder %s867_s10, %s863_s9  ;;  %p86_p4 = scmp.eq.s32.totalorder %s642_s14, 1 }
   0x8   : > { %s932_s18 = scalar_select %p67_p1, %s871_s11, %s69_s16  }
   0x9   : > { %p934_p5 = por %p80_p2, %p79_p0  ;;  %p938_p6 = por %p86_p4, %p85_p3 }
   0xa   : > { %p645_p7 = scmp.ge.s32.totalorder %s875_s12, 1  ;;  %p116_p8 = scmp.lt.s32.totalorder %s875_s12, 3 }
   0xc   : > { %p117_p9 = pnand %p645_p7, %p116_p8 }
   0xd   : > { %s647_s21 = sshll.u32 (!%p117_p9), %s917_s13, 5  ;;  %s135_s17 = sand.u32 (!%p117_p9), 1, %s867_s10  }
   0xe   : > { %120 = sbr.rel (%p117_p9) target bundleno = 351 (0x15f), region = 28  ;;  %p139_p10 = scmp.lt.s32.totalorder (!%p117_p9), %s647_s21, 63 }
   0xf   : > { %s718_s23 = sshll.u32 (!%p117_p9), %s917_s13, 8  ;;  %s565_s13 = scalar_lea.sflag (!%p117_p9), [#allocation3], %s135_s17 }
  0x10   : > { %s576_s27 = scalar_lea.hbm (!%p117_p9), %s1169_s2, %s718_s23  ;;  %s833_s6 = scalar_lea.hbm (!%p117_p9), %s1169_s2, 512 }
  0x11   : > { %s579_s29 = sshll.u32 (!%p117_p9), %s576_s27, 4  ;;  %s580_s29 = int_to_ptr.hbm [resolvable:$true] %s579_s29 }
  0x12   : > { %s827_s30 = sshra.s32 (!%p117_p9), %s580_s29, 4  ;;  %s828_s30 = int_to_ptr.hbm [resolvable:$true] %s827_s30 }
  0x13   : > { %v877_v0 = vmov 0   ;;  %s1177_s21 = smov (!%p139_p10, %s647_s21), 63  ;;  %v418_v22 = vld [vmem:[%s1168_s1 + $0x78] sm:$0xff]  ;;  %v417_v23 = vld [vmem:[%s1168_s1 + $0x70] sm:$0xff]  ;;  %v416_v24 = vld [vmem:[%s1168_s1 + $0x68] sm:$0xff]  ;;  %v177_v51 = vlaneseq  ;;  %v878_v56 = vmov 1.0   ;;  %p834_p0 = scmp.lt.s32.totalorder %s828_s30, %s1169_s2 }
  0x14   : > { %812 = vset.pattern.permute.xlu2 %v877_v0  ;;  %811 = vset.pattern.permute.xlu1 %v877_v0  ;;  %s648_s22 = sshll.u32 %s1177_s21, 3  ;;  %v415_v28 = vld [vmem:[%s1168_s1 + $0x60] sm:$0xff]  ;;  %v414_v29 = vld [vmem:[%s1168_s1 + $0x58] sm:$0xff]  ;;  %v413_v33 = vld [vmem:[%s1168_s1 + $0x50] sm:$0xff]  ;;  %s646_s21 = sshll.u32 %s135_s17, 8 }
  0x15   : > { %810 = vset.pattern.permute.xlu0 %v877_v0  ;;  %s948_s25 = scalar_lea.vmem %s1167_s0, %s648_s22  ;;  %419 = vmatpush.msra.mxu0 %v418_v22  ;;  %v412_v34 = vld [vmem:[%s1168_s1 + $0x48] sm:$0xff]  ;;  %v411_v35 = vld [vmem:[%s1168_s1 + $0x40] sm:$0xff]  ;;  %v410_v36 = vld [vmem:[%s1168_s1 + $0x38] sm:$0xff]  ;;  %v1030_v52 = vand.u32 127, %v177_v51  ;;  %s1099_s22 = scalar_lea.vmem [#allocation2], %s646_s21 }
  0x16   : > { %v162_v1 = vld [vmem:[%s948_s25 + $0x88] sm:$0xff]  ;;  %v161_v2 = vld [vmem:[%s948_s25 + $0x80] sm:$0xff]  ;;  %v163_v7 = vld [vmem:[%s948_s25 + $0x90] sm:$0xff]  ;;  %720 = vmatpush.msra.mxu2 %v418_v22  ;;  %719 = vmatpush.msra.mxu1 %v418_v22  ;;  %s577_s28 = sshll.u32 %s1099_s22, 4  ;;  %s829_s3 = scalar_lea.hbm %s828_s30, 256  ;;  %s578_s28 = int_to_ptr.vmem [resolvable:$true] %s577_s28 }
  0x17   : > { %v145_v3 = vld [vmem:[%s948_s25] sm:$0xff]  ;;  %231 = vperm.xlu2 %812, %v162_v1   ;;  %228 = vperm.xlu0 %810, %v161_v2   ;;  %v170_v4 = vld [vmem:[%s948_s25 + $0xc8] sm:$0xff]  ;;  %v155_v10 = vld [vmem:[%s948_s25 + $0x50] sm:$0xff]  ;;  %p830_p11 = scmp.ne.s32.totalorder %s828_s30, %s829_s3  ;;  %p835_p1 = scmp.lt.s32.totalorder %s833_s6, %s829_s3 }
  0x18   : > { %180 = vperm.xlu1 %811, %v145_v3   ;;  %v169_v5 = vld [vmem:[%s948_s25 + $0xc0] sm:$0xff]  ;;  %v146_v8 = vld [vmem:[%s948_s25 + $0x8] sm:$0xff]  ;;  %v171_v11 = vld [vmem:[%s948_s25 + $0xd0] sm:$0xff]  ;;  %721 = vmatpush.msra.mxu3 %v418_v22 }
  0x19   : > { %v153_v6 = vld [vmem:[%s948_s25 + $0x40] sm:$0xff]  ;;  %v154_v9 = vld [vmem:[%s948_s25 + $0x48] sm:$0xff]  ;;  %v147_v12 = vld [vmem:[%s948_s25 + $0x10] sm:$0xff]  ;;  %420 = vmatpush.msra.mxu0 %v417_v23  ;;  %723 = vmatpush.msra.mxu2 %v417_v23  ;;  %p831_p12 = pnand %p830_p11, %p934_p5  ;;  %p836_p2 = por %p835_p1, %p834_p0 }
  0x1a   : > { %v148_v13 = vld [vmem:[%s948_s25 + $0x18] sm:$0xff]  ;;  %v173_v16 = vld [vmem:[%s948_s25 + $0xe0] sm:$0xff]  ;;  %v166_v19 = vld [vmem:[%s948_s25 + $0xa8] sm:$0xff]  ;;  %722 = vmatpush.msra.mxu1 %v417_v23  ;;  %724 = vmatpush.msra.mxu3 %v417_v23 }
  0x1b   : > { %v164_v14 = vld [vmem:[%s948_s25 + $0x98] sm:$0xff]  ;;  %v165_v18 = vld [vmem:[%s948_s25 + $0xa0] sm:$0xff]  ;;  %v158_v25 = vld [vmem:[%s948_s25 + $0x68] sm:$0xff]  ;;  %421 = vmatpush.msra.mxu0 %v416_v24  ;;  %726 = vmatpush.msra.mxu2 %v416_v24  ;;  %p832_p13 = pneg %p831_p12 }
  0x1c   : > { %v172_v15 = vld [vmem:[%s948_s25 + $0xd8] sm:$0xff]  ;;  %v149_v20 = vld [vmem:[%s948_s25 + $0x20] sm:$0xff]  ;;  %v174_v26 = vld [vmem:[%s948_s25 + $0xe8] sm:$0xff]  ;;  %725 = vmatpush.msra.mxu1 %v416_v24  ;;  %727 = vmatpush.msra.mxu3 %v416_v24 }
  0x1d   : > { %v156_v17 = vld [vmem:[%s948_s25 + $0x58] sm:$0xff]  ;;  %v157_v21 = vld [vmem:[%s948_s25 + $0x60] sm:$0xff]  ;;  %v150_v27 = vld [vmem:[%s948_s25 + $0x28] sm:$0xff]  ;;  %422 = vmatpush.msra.mxu0 %v415_v28  ;;  %729 = vmatpush.msra.mxu2 %v415_v28  ;;  %p837_p3 = pnand %p836_p2, %p832_p13 }
  0x1e   : > { %v151_v30 = vld [vmem:[%s948_s25 + $0x30] sm:$0xff]  ;;  %728 = vmatpush.msra.mxu1 %v415_v28  ;;  %730 = vmatpush.msra.mxu3 %v415_v28  ;;  %v176_v37 = vld [vmem:[%s948_s25 + $0xf8] sm:$0xff]  ;;  %v408_v41 = vld [vmem:[%s1168_s1 + $0x28] sm:$0xff] }
  0x1f   : > { %255 = vperm.xlu2 %812, %v170_v4   ;;  %252 = vperm.xlu0 %810, %v169_v5   ;;  %v167_v31 = vld [vmem:[%s948_s25 + $0xb0] sm:$0xff]  ;;  %v168_v39 = vld [vmem:[%s948_s25 + $0xb8] sm:$0xff]  ;;  %v407_v42 = vld [vmem:[%s1168_s1 + $0x20] sm:$0xff] }
  0x20   : > { %204 = vperm.xlu1 %811, %v153_v6   ;;  %v175_v32 = vld [vmem:[%s948_s25 + $0xf0] sm:$0xff]  ;;  %423 = vmatpush.msra.mxu0 %v414_v29  ;;  %v152_v43 = vld [vmem:[%s948_s25 + $0x38] sm:$0xff]  ;;  %v404_v47 = vld [vmem:[%s1168_s1 + $0x8] sm:$0xff] }
  0x21   : > { %732 = vmatpush.msra.mxu2 %v414_v29  ;;  %731 = vmatpush.msra.mxu1 %v414_v29  ;;  %v159_v38 = vld [vmem:[%s948_s25 + $0x70] sm:$0xff]  ;;  %v406_v44 = vld [vmem:[%s1168_s1 + $0x18] sm:$0xff]  ;;  %v403_v48 = vld [vmem:[%s1168_s1] sm:$0xff] }
  0x22   : > { %733 = vmatpush.msra.mxu3 %v414_v29  ;;  %424 = vmatpush.msra.mxu0 %v413_v33  ;;  %v409_v40 = vld [vmem:[%s1168_s1 + $0x30] sm:$0xff]  ;;  %v160_v45 = vld [vmem:[%s948_s25 + $0x78] sm:$0xff] }
  0x23   : > { %735 = vmatpush.msra.mxu2 %v413_v33  ;;  %734 = vmatpush.msra.mxu1 %v413_v33  ;;  %v405_v46 = vld [vmem:[%s1168_s1 + $0x10] sm:$0xff] }
  0x24   : > { %425 = vmatpush.msra.mxu0 %v412_v34  ;;  %736 = vmatpush.msra.mxu3 %v413_v33 }
  0x25   : > { %738 = vmatpush.msra.mxu2 %v412_v34  ;;  %737 = vmatpush.msra.mxu1 %v412_v34 }
  0x26   : > { %426 = vmatpush.msra.mxu0 %v411_v35  ;;  %739 = vmatpush.msra.mxu3 %v412_v34 }
  0x27   : > { %234 = vperm.xlu2 %812, %v163_v7   ;;  %183 = vperm.xlu0 %810, %v146_v8  }
  0x28   : > { %207 = vperm.xlu1 %811, %v154_v9   ;;  %741 = vmatpush.msra.mxu2 %v411_v35 }
  0x29   : > { %740 = vmatpush.msra.mxu1 %v411_v35  ;;  %427 = vmatpush.msra.mxu0 %v410_v36 }
  0x2a   : > { %742 = vmatpush.msra.mxu3 %v411_v35  ;;  %744 = vmatpush.msra.mxu2 %v410_v36 }
  0x2b   : > { %428 = vmatpush.msra.mxu0 %v409_v40  ;;  %743 = vmatpush.msra.mxu1 %v410_v36 }
  0x2c   : > { %747 = vmatpush.msra.mxu2 %v409_v40  ;;  %745 = vmatpush.msra.mxu3 %v410_v36 }
  0x2d   : > { %429 = vmatpush.msra.mxu0 %v408_v41  ;;  %746 = vmatpush.msra.mxu1 %v409_v40 }
  0x2e   : > { %750 = vmatpush.msra.mxu2 %v408_v41  ;;  %748 = vmatpush.msra.mxu3 %v409_v40 }
  0x2f   : > { %210 = vperm.xlu2 %812, %v155_v10   ;;  %258 = vperm.xlu0 %810, %v171_v11  }
  0x30   : > { %186 = vperm.xlu1 %811, %v147_v12   ;;  %430 = vmatpush.msra.mxu0 %v407_v42 }
  0x31   : > { %749 = vmatpush.msra.mxu1 %v408_v41  ;;  %753 = vmatpush.msra.mxu2 %v407_v42 }
  0x32   : > { %751 = vmatpush.msra.mxu3 %v408_v41  ;;  %431 = vmatpush.msra.mxu0 %v406_v44 }
  0x33   : > { %756 = vmatpush.msra.mxu2 %v406_v44  ;;  %752 = vmatpush.msra.mxu1 %v407_v42 }
  0x34   : > { %432 = vmatpush.msra.mxu0 %v405_v46  ;;  %754 = vmatpush.msra.mxu3 %v407_v42 }
  0x35   : > { %759 = vmatpush.msra.mxu2 %v405_v46  ;;  %755 = vmatpush.msra.mxu1 %v406_v44 }
  0x36   : > { %433 = vmatpush.msra.mxu0 %v404_v47  ;;  %757 = vmatpush.msra.mxu3 %v406_v44 }
  0x37   : > { %189 = vperm.xlu2 %812, %v148_v13   ;;  %237 = vperm.xlu0 %810, %v164_v14  }
  0x38   : > { %261 = vperm.xlu1 %811, %v172_v15   ;;  %762 = vmatpush.msra.mxu2 %v404_v47 }
  0x39   : > { %434 = vmatpush.msra.mxu0 %v403_v48  ;;  %758 = vmatpush.msra.mxu1 %v405_v46 }
  0x3a   : > { %765 = vmatpush.msra.mxu2 %v403_v48  ;;  %760 = vmatpush.msra.mxu3 %v405_v46 }
  0x3b   : > { %761 = vmatpush.msra.mxu1 %v404_v47 }
  0x3c   : > { %763 = vmatpush.msra.mxu3 %v404_v47 }
  0x3d   : > { %764 = vmatpush.msra.mxu1 %v403_v48 }
  0x3e   : > { %766 = vmatpush.msra.mxu3 %v403_v48 }
  0x3f   : > { %264 = vperm.xlu2 %812, %v173_v16   ;;  %213 = vperm.xlu0 %810, %v156_v17  }
  0x40   : > { %240 = vperm.xlu1 %811, %v165_v18  }
  0x47   : > { %243 = vperm.xlu2 %812, %v166_v19   ;;  %192 = vperm.xlu0 %810, %v149_v20  }
  0x48   : > { %216 = vperm.xlu1 %811, %v157_v21  }
  0x4f   : > { %219 = vperm.xlu2 %812, %v158_v25   ;;  %267 = vperm.xlu0 %810, %v174_v26  }
  0x50   : > { %195 = vperm.xlu1 %811, %v150_v27  }
  0x57   : > { %198 = vperm.xlu2 %812, %v151_v30   ;;  %246 = vperm.xlu0 %810, %v167_v31  }
  0x58   : > { %270 = vperm.xlu1 %811, %v175_v32  }
  0x5f   : > { %273 = vperm.xlu2 %812, %v176_v37   ;;  %222 = vperm.xlu0 %810, %v159_v38  }
  0x60   : > { %249 = vperm.xlu1 %811, %v168_v39  }
  0x67   : > { %201 = vperm.xlu0 %810, %v152_v43  }
  0x68   : > { %225 = vperm.xlu1 %811, %v160_v45  }
  0x71   : > { %v232_v49 = vpop.permute.xlu2 %231 }
  0x72   : > { %vm292_vm2 = vcmp.eq.s32.totalorder %v1030_v52, %v232_v49 }
  0x79   : > { %v256_v50 = vpop.permute.xlu2 %255 }
  0x7a   : > { %vm300_vm7 = vcmp.eq.s32.totalorder %v1030_v52, %v256_v50 }
  0x81   : > { %v235_v54 = vpop.permute.xlu2 %234 }
  0x82   : > { %vm293_vm5 = vcmp.eq.s32.totalorder %v1030_v52, %v235_v54 }
  0x89   : > { %v229_v53 = vpop.permute.xlu0 %228  ;;  %v211_v59 = vpop.permute.xlu2 %210 }
  0x8a   : > { %vm291_vm0 = vcmp.eq.s32.totalorder %v1030_v52, %v229_v53  ;;  %v181_v55 = vpop.permute.xlu1 %180  ;;  %vm285_vm10 = vcmp.eq.s32.totalorder %v1030_v52, %v211_v59 }
  0x8b   : > { %vm275_vm1 = vcmp.eq.s32.totalorder %v1030_v52, %v181_v55  ;;  %697 = vmatmul.msk.f32.vlgmr.msra.gmra.mxu2 %vm291_vm0, %v878_v56 }
  0x8c   : > { %681 = vmatmul.msk.f32.vlgmr.msra.gmra.mxu0 %vm275_vm1, %v878_v56 }
  0x91   : > { %v253_v57 = vpop.permute.xlu0 %252  ;;  %v190_v62 = vpop.permute.xlu2 %189 }
  0x92   : > { %vm299_vm3 = vcmp.eq.s32.totalorder %v1030_v52, %v253_v57  ;;  %v205_v58 = vpop.permute.xlu1 %204  ;;  %vm278_vm13 = vcmp.eq.s32.totalorder %v1030_v52, %v190_v62 }
  0x93   : > { %vm283_vm4 = vcmp.eq.s32.totalorder %v1030_v52, %v205_v58  ;;  %698 = vmatmul.msk.f32.gmra.mxu2 %vm292_vm2, %v878_v56  ;;  %705 = vmatmul.msk.f32.vlgmr.msra.gmra.mxu3 %vm299_vm3, %v878_v56 }
  0x94   : > { %689 = vmatmul.msk.f32.vlgmr.msra.gmra.mxu1 %vm283_vm4, %v878_v56 }
  0x99   : > { %v184_v60 = vpop.permute.xlu0 %183  ;;  %v265_v1 = vpop.permute.xlu2 %264 }
  0x9a   : > { %vm276_vm6 = vcmp.eq.s32.totalorder %v1030_v52, %v184_v60  ;;  %v208_v61 = vpop.permute.xlu1 %207  ;;  %vm303_vm1 = vcmp.eq.s32.totalorder %v1030_v52, %v265_v1 }
  0x9b   : > { %vm284_vm8 = vcmp.eq.s32.totalorder %v1030_v52, %v208_v61  ;;  %682 = vmatmul.msk.f32.gmra.mxu0 %vm276_vm6, %v878_v56  ;;  %699 = vmatmul.msk.f32.gmra.mxu2 %vm293_vm5, %v878_v56 }
  0x9c   : > { %690 = vmatmul.msk.f32.gmra.mxu1 %vm284_vm8, %v878_v56  ;;  %706 = vmatmul.msk.f32.gmra.mxu3 %vm300_vm7, %v878_v56 }
  0xa1   : > { %v259_v63 = vpop.permute.xlu0 %258  ;;  %v244_v5 = vpop.permute.xlu2 %243 }
  0xa2   : > { %vm301_vm9 = vcmp.eq.s32.totalorder %v1030_v52, %v259_v63  ;;  %v187_v0 = vpop.permute.xlu1 %186  ;;  %vm296_vm3 = vcmp.eq.s32.totalorder %v1030_v52, %v244_v5 }
  0xa3   : > { %vm277_vm11 = vcmp.eq.s32.totalorder %v1030_v52, %v187_v0 }
  0xa4   : > { %683 = vmatmul.msk.f32.gmra.mxu0 %vm277_vm11, %v878_v56  ;;  %691 = vmatmul.msk.f32.gmra.mxu1 %vm285_vm10, %v878_v56 }
  0xa5   : > { %707 = vmatmul.msk.f32.gmra.mxu3 %vm301_vm9, %v878_v56 }
  0xa9   : > { %v238_v2 = vpop.permute.xlu0 %237  ;;  %v220_v9 = vpop.permute.xlu2 %219 }
  0xaa   : > { %vm294_vm12 = vcmp.eq.s32.totalorder %v1030_v52, %v238_v2  ;;  %v262_v3 = vpop.permute.xlu1 %261  ;;  %vm288_vm6 = vcmp.eq.s32.totalorder %v1030_v52, %v220_v9 }
  0xab   : > { %vm302_vm14 = vcmp.eq.s32.totalorder %v1030_v52, %v262_v3  ;;  %700 = vmatmul.msk.f32.gmra.mxu2 %vm294_vm12, %v878_v56 }
  0xac   : > { %684 = vmatmul.msk.f32.gmra.mxu0 %vm278_vm13, %v878_v56 }
  0xad   : > { %708 = vmatmul.msk.f32.gmra.mxu3 %vm302_vm14, %v878_v56 }
  0xb1   : > { %v214_v4 = vpop.permute.xlu0 %213  ;;  %v199_v12 = vpop.permute.xlu2 %198 }
  0xb2   : > { %vm286_vm15 = vcmp.eq.s32.totalorder %v1030_v52, %v214_v4  ;;  %v241_v6 = vpop.permute.xlu1 %240  ;;  %vm281_vm9 = vcmp.eq.s32.totalorder %v1030_v52, %v199_v12 }
  0xb3   : > { %vm295_vm0 = vcmp.eq.s32.totalorder %v1030_v52, %v241_v6  ;;  %692 = vmatmul.msk.f32.gmra.mxu1 %vm286_vm15, %v878_v56 }
  0xb4   : > { %701 = vmatmul.msk.f32.gmra.mxu2 %vm295_vm0, %v878_v56 }
  0xb5   : > { %709 = vmatmul.msk.f32.gmra.mxu3 %vm303_vm1, %v878_v56 }
  0xb9   : > { %v193_v7 = vpop.permute.xlu0 %192  ;;  %v274_v15 = vpop.permute.xlu2 %273 }
  0xba   : > { %vm279_vm2 = vcmp.eq.s32.totalorder %v1030_v52, %v193_v7  ;;  %v217_v8 = vpop.permute.xlu1 %216  ;;  %vm306_vm12 = vcmp.eq.s32.totalorder %v1030_v52, %v274_v15 }
  0xbb   : > { %vm287_vm4 = vcmp.eq.s32.totalorder %v1030_v52, %v217_v8  ;;  %685 = vmatmul.msk.f32.gmra.mxu0 %vm279_vm2, %v878_v56 }
  0xbc   : > { %693 = vmatmul.msk.f32.gmra.mxu1 %vm287_vm4, %v878_v56  ;;  %702 = vmatmul.msk.f32.gmra.mxu2 %vm296_vm3, %v878_v56 }
  0xc1   : > { %v268_v10 = vpop.permute.xlu0 %267 }
  0xc2   : > { %vm304_vm5 = vcmp.eq.s32.totalorder %v1030_v52, %v268_v10  ;;  %v196_v11 = vpop.permute.xlu1 %195 }
  0xc3   : > { %vm280_vm7 = vcmp.eq.s32.totalorder %v1030_v52, %v196_v11  ;;  %710 = vmatmul.msk.f32.gmra.mxu3 %vm304_vm5, %v878_v56 }
  0xc4   : > { %686 = vmatmul.msk.f32.gmra.mxu0 %vm280_vm7, %v878_v56  ;;  %694 = vmatmul.msk.f32.gmra.mxu1 %vm288_vm6, %v878_v56 }
  0xc9   : > { %v247_v13 = vpop.permute.xlu0 %246 }
  0xca   : > { %vm297_vm8 = vcmp.eq.s32.totalorder %v1030_v52, %v247_v13  ;;  %v271_v14 = vpop.permute.xlu1 %270 }
  0xcb   : > { %vm305_vm10 = vcmp.eq.s32.totalorder %v1030_v52, %v271_v14  ;;  %703 = vmatmul.msk.f32.gmra.mxu2 %vm297_vm8, %v878_v56 }
  0xcc   : > { %687 = vmatmul.msk.f32.gmra.mxu0 %vm281_vm9, %v878_v56  ;;  %711 = vmatmul.msk.f32.gmra.mxu3 %vm305_vm10, %v878_v56 }
  0xd1   : > { %v223_v16 = vpop.permute.xlu0 %222 }
  0xd2   : > { %vm289_vm11 = vcmp.eq.s32.totalorder %v1030_v52, %v223_v16  ;;  %v250_v17 = vpop.permute.xlu1 %249 }
  0xd3   : > { %vm298_vm13 = vcmp.eq.s32.totalorder %v1030_v52, %v250_v17  ;;  %695 = vmatmul.msk.f32.gmra.mxu1 %vm289_vm11, %v878_v56 }
  0xd4   : > { %704 = vmatmul.msk.f32.gmra.mxu2 %vm298_vm13, %v878_v56  ;;  %712 = vmatmul.msk.f32.gmra.mxu3 %vm306_vm12, %v878_v56 }
  0xd9   : > { %v202_v18 = vpop.permute.xlu0 %201 }
  0xda   : > { %vm282_vm14 = vcmp.eq.s32.totalorder %v1030_v52, %v202_v18  ;;  %v226_v19 = vpop.permute.xlu1 %225 }
  0xdb   : > { %vm290_vm15 = vcmp.eq.s32.totalorder %v1030_v52, %v226_v19  ;;  %688 = vmatmul.msk.f32.gmra.mxu0 %vm282_vm14, %v878_v56 }
  0xdc   : > { %696 = vmatmul.msk.f32.gmra.mxu1 %vm290_vm15, %v878_v56 }
 0x109   : > { %v436_v20 = vpop.f32.mrf.mxu0 }
 0x10a   : > { %532 = vst [vmem:[%s1099_s22] sm:$0xff] %v436_v20 }
 0x10e   : > { %v484_v21 = vpop.f32.mrf.mxu2 }
 0x10f   : > { %548 = vst [vmem:[%s1099_s22 + $0x80] sm:$0xff] %v484_v21 }
 0x111   : > { %v460_v22 = vpop.f32.mrf.mxu1 }
 0x112   : > { %540 = vst [vmem:[%s1099_s22 + $0x40] sm:$0xff] %v460_v22 }
 0x116   : > { %v487_v23 = vpop.f32.mrf.mxu2  ;;  %v508_v24 = vpop.f32.mrf.mxu3 }
 0x117   : > { %549 = vst [vmem:[%s1099_s22 + $0x88] sm:$0xff] %v487_v23 }
 0x118   : > { %556 = vst [vmem:[%s1099_s22 + $0xc0] sm:$0xff] %v508_v24  ;;  %v439_v25 = vpop.f32.mrf.mxu0 }
 0x119   : > { %533 = vst [vmem:[%s1099_s22 + $0x8] sm:$0xff] %v439_v25  ;;  %v463_v26 = vpop.f32.mrf.mxu1 }
 0x11a   : > { %541 = vst [vmem:[%s1099_s22 + $0x48] sm:$0xff] %v463_v26 }
 0x11e   : > { %v490_v27 = vpop.f32.mrf.mxu2 }
 0x11f   : > { %550 = vst [vmem:[%s1099_s22 + $0x90] sm:$0xff] %v490_v27  ;;  %v511_v28 = vpop.f32.mrf.mxu3 }
 0x120   : > { %557 = vst [vmem:[%s1099_s22 + $0xc8] sm:$0xff] %v511_v28 }
 0x121   : > { %v442_v29 = vpop.f32.mrf.mxu0  ;;  %v466_v30 = vpop.f32.mrf.mxu1 }
 0x122   : > { %534 = vst [vmem:[%s1099_s22 + $0x10] sm:$0xff] %v442_v29 }
 0x123   : > { %542 = vst [vmem:[%s1099_s22 + $0x50] sm:$0xff] %v466_v30 }
 0x128   : > { %v514_v31 = vpop.f32.mrf.mxu3 }
 0x129   : > { %558 = vst [vmem:[%s1099_s22 + $0xd0] sm:$0xff] %v514_v31  ;;  %v445_v32 = vpop.f32.mrf.mxu0 }
 0x12a   : > { %535 = vst [vmem:[%s1099_s22 + $0x18] sm:$0xff] %v445_v32 }
 0x12e   : > { %v493_v33 = vpop.f32.mrf.mxu2 }
 0x12f   : > { %551 = vst [vmem:[%s1099_s22 + $0x98] sm:$0xff] %v493_v33 }
 0x130   : > { %v517_v34 = vpop.f32.mrf.mxu3  ;;  %v469_v35 = vpop.f32.mrf.mxu1 }
 0x131   : > { %559 = vst [vmem:[%s1099_s22 + $0xd8] sm:$0xff] %v517_v34 }
 0x132   : > { %543 = vst [vmem:[%s1099_s22 + $0x58] sm:$0xff] %v469_v35 }
 0x137   : > { %v496_v36 = vpop.f32.mrf.mxu2 }
 0x138   : > { %552 = vst [vmem:[%s1099_s22 + $0xa0] sm:$0xff] %v496_v36  ;;  %v520_v37 = vpop.f32.mrf.mxu3  ;;  %v448_v38 = vpop.f32.mrf.mxu0 }
 0x139   : > { %560 = vst [vmem:[%s1099_s22 + $0xe0] sm:$0xff] %v520_v37  ;;  %v472_v39 = vpop.f32.mrf.mxu1 }
 0x13a   : > { %536 = vst [vmem:[%s1099_s22 + $0x20] sm:$0xff] %v448_v38 }
 0x13b   : > { %544 = vst [vmem:[%s1099_s22 + $0x60] sm:$0xff] %v472_v39 }
 0x13f   : > { %v499_v40 = vpop.f32.mrf.mxu2 }
 0x140   : > { %553 = vst [vmem:[%s1099_s22 + $0xa8] sm:$0xff] %v499_v40 }
 0x141   : > { %v451_v41 = vpop.f32.mrf.mxu0  ;;  %v475_v42 = vpop.f32.mrf.mxu1 }
 0x142   : > { %537 = vst [vmem:[%s1099_s22 + $0x28] sm:$0xff] %v451_v41 }
 0x143   : > { %545 = vst [vmem:[%s1099_s22 + $0x68] sm:$0xff] %v475_v42 }
 0x146   : > { %v523_v43 = vpop.f32.mrf.mxu3 }
 0x147   : > { %561 = vst [vmem:[%s1099_s22 + $0xe8] sm:$0xff] %v523_v43 }
 0x149   : > { %v454_v44 = vpop.f32.mrf.mxu0 }
 0x14a   : > { %538 = vst [vmem:[%s1099_s22 + $0x30] sm:$0xff] %v454_v44 }
 0x14e   : > { %v502_v45 = vpop.f32.mrf.mxu2 }
 0x14f   : > { %554 = vst [vmem:[%s1099_s22 + $0xb0] sm:$0xff] %v502_v45  ;;  %v526_v46 = vpop.f32.mrf.mxu3 }
 0x150   : > { %562 = vst [vmem:[%s1099_s22 + $0xf0] sm:$0xff] %v526_v46  ;;  %v478_v47 = vpop.f32.mrf.mxu1 }
 0x151   : > { %546 = vst [vmem:[%s1099_s22 + $0x70] sm:$0xff] %v478_v47 }
 0x157   : > { %v505_v48 = vpop.f32.mrf.mxu2  ;;  %v529_v49 = vpop.f32.mrf.mxu3 }
 0x158   : > { %555 = vst [vmem:[%s1099_s22 + $0xb8] sm:$0xff] %v505_v48  ;;  %v457_v50 = vpop.f32.mrf.mxu0 }
 0x159   : > { %563 = vst [vmem:[%s1099_s22 + $0xf8] sm:$0xff] %v529_v49  ;;  %v481_v51 = vpop.f32.mrf.mxu1 }
 0x15a   : > { %539 = vst [vmem:[%s1099_s22 + $0x38] sm:$0xff] %v457_v50 }
 0x15b   : > { %547 = vst [vmem:[%s1099_s22 + $0x78] sm:$0xff] %v481_v51 }
 0x15c   : > { %840 = shalt.err (!%p837_p3)
}
 0x15d   : > { %s879_s14 = smov 128   ;;  %s880_s25 = smov 8  }
 0x15e   : > { %767 = dma.vmem_to_hbm [thread:$0]  (%p934_p5), %s578_s28, 4096, %s580_s29, %s565_s13, %s879_s14, %s879_s14, %s880_s25  }
 0x15f PF: > { %p773_p4 = scmp.ge.s32.totalorder %s875_s12, 2  ;;  %s594_s16 = sand.u32 1, %s863_s9  }
 0x160   : > { %s595_s17 = scalar_lea.sflag [#allocation3], %s594_s16 }
 0x161   : > { %p770_p7 = pnand %p773_p4, %p938_p6 }
 0x163   : > { %p771_p8 = pneg %p770_p7 }
 0x165   : > { %858 = dma.done.wait (%p771_p8), %s595_s17, 4096  }
 0x166   : > { %860 = vsyncadd (%p771_p8), %s595_s17, 4294963200  ;;  %p12_p9 = scmp.ge.s32.totalorder %s921_s15, 4   ;;  %s1172_s9 = smov %s867_s10 }
 0x167   : > { %s1173_s10 = smov %s871_s11  ;;  %s1174_s11 = smov %s932_s18 }
 0x168   : > { %s1175_s12 = smov %s921_s15  ;;  %14 = sbr.rel (!%p12_p9) target bundleno = 3 (0x3), region = 63 }
 0x16d   :  { %601 = vsyncpa [#allocation3], 1 }
 0x16e   :  { %603 = vsyncpa [#allocation3 + $0x1], 1 }

</bundles_post_ra>
